<compile_context>
chip_gen: v5e
topology: v5e:2x2
jax: 0.10.0
libtpu: 0.0.40
codegen_flags: <defaults>
</compile_context>

<pallas_src>
import math

import jax
import jax.numpy as jnp
from jax.experimental import pallas as pl
from jax.experimental.pallas import tpu as pltpu


# ---------------------------------------------------------------------------
# Kernels
# ---------------------------------------------------------------------------

def _kerne_linear_kernel_bias(x_ref, w_ref, b_ref, o_ref):
    # x_ref: (tn, C)    streamed activation tile (compute dtype, e.g. bf16)
    # w_ref: (C, tkd)   folded weight tile (resident across the inner N axis)
    # b_ref: (1, tkd)   folded bias tile
    # o_ref: (tn, tkd)  lane-dense output tile (out dtype)
    acc = jnp.dot(x_ref[...], w_ref[...], preferred_element_type=jnp.float32)
    o_ref[...] = (acc + b_ref[...].astype(jnp.float32)).astype(o_ref.dtype)


def _kerne_linear_kernel_nobias(x_ref, w_ref, o_ref):
    acc = jnp.dot(x_ref[...], w_ref[...], preferred_element_type=jnp.float32)
    o_ref[...] = acc.astype(o_ref.dtype)


# ---------------------------------------------------------------------------
# Helpers
# ---------------------------------------------------------------------------

def _round_up(v, m):
    return ((v + m - 1) // m) * m


def _cdiv(a, b):
    return -(-a // b)


def _vmem_capacity_bytes():
    try:
        cap = int(pltpu.get_tpu_info().vmem_capacity_bytes)
        if cap > 0:
            return cap
    except Exception:
        pass
    return 64 << 20   # conservative fallback = v7x per-TensorCore VMEM


def fold_kerne_linear_params(weight, bias=None, *, compute_dtype=jnp.bfloat16):
    """Fold (K, C, D) -> (C, K*Dp) lane-dense layout.  Do this ONCE at init.

    D is zero-padded per K group (only when K*D is not already a multiple of
    128) so every output store in the kernel is an unmasked 128-aligned vst.
    Returns (w2d, b2d_or_None, d_padded).
    """
    k, c, d = weight.shape
    if (k * d) % 128 == 0:
        dp = d
    else:
        dp = _round_up(d, 128 // math.gcd(k, 128))
    w, b = weight, bias
    if dp != d:
        w = jnp.pad(w, ((0, 0), (0, 0), (0, dp - d)))
        if b is not None:
            b = jnp.pad(b, ((0, 0), (0, dp - d)))
    w2d = jnp.transpose(w, (1, 0, 2)).reshape(c, k * dp).astype(compute_dtype)
    b2d = None if b is None else b.reshape(1, k * dp).astype(compute_dtype)
    return w2d, b2d, dp


# ---------------------------------------------------------------------------
# Forward
# ---------------------------------------------------------------------------

def kerne_linear_folded(x, w2d, b2d, kernel_size, out_dim, *,
                        out_dtype=None, tn_max=512):
    """x: (b, obj_num, C); w2d: (C, K*Dp) folded weight; b2d: (1, K*Dp) or None.

    Returns (b*obj_num, K, out_dim) in `out_dtype` (default: x.dtype).
    """
    b_size, obj_num, c = x.shape
    n = b_size * obj_num
    c_w, kdp = w2d.shape
    assert c == c_w, "x feature dim must match folded weight"
    assert kdp % kernel_size == 0
    dp = kdp // kernel_size
    assert dp >= out_dim
    compute_dtype = w2d.dtype
    out_dtype = x.dtype if out_dtype is None else out_dtype

    x2d = x.reshape(n, c).astype(compute_dtype)

    csz = jnp.dtype(compute_dtype).itemsize
    osz = jnp.dtype(out_dtype).itemsize

    # ---- tile selection under a per-chip VMEM budget ------------------------
    cap = _vmem_capacity_bytes()
    budget = int(cap * 0.6)                 # leave room for compiler scratch

    # >= 2 grid steps along N whenever possible (v7x megacore sharding).
    tn = min(tn_max, max(8, _round_up((n + 1) // 2, 8)))

    def footprint(tn_, tkd_, kd_tiles_):
        wbuf = 1 if kd_tiles_ == 1 else 2        # resident weight single-buffered
        return (c * tkd_ * csz * wbuf            # weight block(s)
                + 8 * tkd_ * csz * wbuf          # bias block(s) (sublane-padded)
                + 2 * tn_ * c * csz              # double-buffered x tiles
                + 2 * tn_ * tkd_ * osz)          # double-buffered out tiles

    tkd, kd_tiles = kdp, 1
    while footprint(tn, tkd, kd_tiles) > budget and tkd > 128:
        tkd = max(128, _round_up(tkd // 2, 128))
        kd_tiles = _cdiv(kdp, tkd)
    while footprint(tn, tkd, kd_tiles) > budget and tn > 8:
        tn = max(8, _round_up(tn // 2, 8))
    n_tiles = _cdiv(n, tn)

    vmem_limit = max(footprint(tn, tkd, kd_tiles) + (8 << 20), 32 << 20)
    vmem_limit = int(min(vmem_limit, int(cap * 0.85), 100 << 20))

    cost = pl.CostEstimate(
        flops=2 * n * c * kdp,
        transcendentals=0,
        bytes_accessed=(n * c * csz * kd_tiles   # x (re-read once per KD tile)
                        + c * kdp * csz          # weight (read exactly once)
                        + (kdp * csz if b2d is not None else 0)
                        + n * kdp * osz),        # output
    )

    def run(single_buffer_resident):
        resident = single_buffer_resident and kd_tiles == 1
        if resident:
            w_spec = pl.BlockSpec((c, tkd), lambda j, i: (0, j),
                                  pipeline_mode=pl.Buffered(1))
        else:
            w_spec = pl.BlockSpec((c, tkd), lambda j, i: (0, j))
        in_specs = [pl.BlockSpec((tn, c), lambda j, i: (i, 0)), w_spec]
        operands = [x2d, w2d]
        if b2d is not None:
            if resident:
                b_spec = pl.BlockSpec((1, tkd), lambda j, i: (0, j),
                                      pipeline_mode=pl.Buffered(1))
            else:
                b_spec = pl.BlockSpec((1, tkd), lambda j, i: (0, j))
            in_specs.append(b_spec)
            operands.append(b2d)
            kernel = _kerne_linear_kernel_bias
        else:
            kernel = _kerne_linear_kernel_nobias

        return pl.pallas_call(
            kernel,
            out_shape=jax.ShapeDtypeStruct((n, kdp), out_dtype),
            grid_spec=pltpu.PrefetchScalarGridSpec(
                num_scalar_prefetch=0,
                grid=(kd_tiles, n_tiles),            # KD outer, N inner
                in_specs=in_specs,
                out_specs=pl.BlockSpec((tn, tkd), lambda j, i: (i, j)),
            ),
            compiler_params=pltpu.CompilerParams(
                dimension_semantics=("parallel", "parallel"),
                vmem_limit_bytes=vmem_limit),
            cost_estimate=cost,
        )(*operands)

    try:
        out2d = run(True)
    except Exception:
        # Compat fallback: pipeline_mode=pl.Buffered(1) not supported on this
        # jax build -> fall back to default double-buffering for the weight.
        out2d = run(False)

    out = out2d.reshape(n, kernel_size, dp)          # row-major reshape: free
    if dp != out_dim:
        out = out[:, :, :out_dim]                    # drop lane-padding columns
    return out


def kerne_linear(x, weight, bias=None, *, compute_dtype=jnp.bfloat16,
                 out_dtype=None, tn_max=512):
    """One-shot API.  NOTE: folds the weight on every call — prefer folding
    once with fold_kerne_linear_params() and calling kerne_linear_folded()."""
    k, _, d = weight.shape
    w2d, b2d, _ = fold_kerne_linear_params(weight, bias, compute_dtype=compute_dtype)
    return kerne_linear_folded(x, w2d, b2d, k, d, out_dtype=out_dtype, tn_max=tn_max)


def init_params(key, kernel_size, in_dim, out_dim, dtype=jnp.float32):
    """Deterministic init mirroring the module's reset_parameters()."""
    kw, kb = jax.random.split(key)
    # kaiming_uniform_(a=sqrt(5)) on (K, in_dim, out_dim): fan_in = in_dim*out_dim
    w_bound = 1.0 / math.sqrt(in_dim * out_dim)
    weight = jax.random.uniform(kw, (kernel_size, in_dim, out_dim),
                                dtype=dtype, minval=-w_bound, maxval=w_bound)
    b_bound = 1.0 / math.sqrt(in_dim)
    bias = jax.random.uniform(kb, (kernel_size, out_dim),
                              dtype=dtype, minval=-b_bound, maxval=b_bound)
    return weight, bias


if __name__ == "__main__":
    key = jax.random.PRNGKey(0)
    kx, kp = jax.random.split(key)

    b_size, obj_num, in_dim = 2, 8, 32
    out_dim, kernel_size = 32, 4

    x = jax.random.normal(kx, (b_size, obj_num, in_dim), dtype=jnp.float32)
    weight, bias = init_params(kp, kernel_size, in_dim, out_dim)

    # Fold the parameters once (this is what module init / weight-load does).
    w2d, b2d, _ = fold_kerne_linear_params(weight, bias)

    out = kerne_linear_folded(x, w2d, b2d, kernel_size, out_dim)
    out = jax.block_until_ready(out)
    assert out.shape == (b_size * obj_num, kernel_size, out_dim)

    # Matched-precision reference (same bf16 input rounding, f32 accumulation).
    x32 = x.reshape(-1, in_dim).astype(jnp.bfloat16).astype(jnp.float32)
    w32 = weight.astype(jnp.bfloat16).astype(jnp.float32)
    bb32 = bias.astype(jnp.bfloat16).astype(jnp.float32)
    ref_matched = jnp.einsum("nc,kcd->nkd", x32, w32) + bb32[None]
    assert jnp.allclose(out, ref_matched, atol=1e-3, rtol=1e-3)

    # Loose check against the full-f32 PyTorch-equivalent math (bf16 inputs
    # introduce ~1e-3..1e-2 absolute error at these magnitudes).
    ref_f32 = jnp.einsum("nc,kcd->nkd", x.reshape(-1, in_dim), weight) + bias[None]
    assert jnp.allclose(out, ref_f32, atol=3e-2, rtol=3e-2)

    print("KERNEL_OK")
</pallas_src>

<mosaic_0001>
module attributes {stable_mosaic.version = 11 : i64} {
  func.func @_kerne_linear_kernel_bias(%arg0: i32, %arg1: i32, %arg2: memref<8x32xbf16, #tpu.memory_space<vmem>>, %arg3: memref<32x128xbf16, #tpu.memory_space<vmem>>, %arg4: memref<1x128xbf16, #tpu.memory_space<vmem>>, %arg5: memref<8x128xf32, #tpu.memory_space<vmem>>) attributes {dimension_semantics = [#tpu.dimension_semantics<parallel>, #tpu.dimension_semantics<parallel>], iteration_bounds = array<i64: 1, 2>, scalar_prefetch = 0 : i64, scratch_operands = 0 : i64, tpu.core_type = #tpu.core_type<tc>, window_params = [{transform_indices = @transform_0, window_bounds = array<i64: 8, 32>}, {pipeline_mode = #tpu.pipeline_mode<synchronous>, transform_indices = @transform_1, window_bounds = array<i64: 32, 128>}, {pipeline_mode = #tpu.pipeline_mode<synchronous>, transform_indices = @transform_2, window_bounds = array<i64: 1, 128>}, {transform_indices = @transform_3, window_bounds = array<i64: 8, 128>}]} {
    %c0 = arith.constant 0 : index
    %c0_0 = arith.constant 0 : index
    %0 = vector.load %arg2[%c0, %c0_0] : memref<8x32xbf16, #tpu.memory_space<vmem>>, vector<8x32xbf16>
    %c0_1 = arith.constant 0 : index
    %c0_2 = arith.constant 0 : index
    %1 = vector.load %arg3[%c0_1, %c0_2] : memref<32x128xbf16, #tpu.memory_space<vmem>>, vector<32x128xbf16>
    %cst = arith.constant dense<0.000000e+00> : vector<8x128xf32>
    %2 = tpu.matmul %0, %1, %cst {dimension_numbers = #tpu.dot_dimension_numbers<[1], [0], [0], [1], [0, 0, 1, 1], [], []>} : vector<8x32xbf16>, vector<32x128xbf16>, vector<8x128xf32> -> vector<8x128xf32>
    %c0_3 = arith.constant 0 : index
    %c0_4 = arith.constant 0 : index
    %3 = vector.load %arg4[%c0_3, %c0_4] : memref<1x128xbf16, #tpu.memory_space<vmem>>, vector<1x128xbf16>
    %4 = arith.extf %3 : vector<1x128xbf16> to vector<1x128xf32>
    %5 = vector.broadcast %4 : vector<1x128xf32> to vector<8x128xf32>
    %6 = arith.addf %2, %5 : vector<8x128xf32>
    %c0_5 = arith.constant 0 : index
    %c0_6 = arith.constant 0 : index
    %7 = vector.load %arg5[%c0_5, %c0_6] : memref<8x128xf32, #tpu.memory_space<vmem>>, vector<8x128xf32>
    tpu.vector_store %arg5[%c0_5, %c0_6], %6 {strides = array<i32>} : memref<8x128xf32, #tpu.memory_space<vmem>>, vector<8x128xf32>,
    return
  }
  func.func @transform_0(%arg0: i32, %arg1: i32) -> (i32, i32) {
    %c0_i32 = arith.constant 0 : i32
    %c0_i32_0 = arith.constant 0 : i32
    return %arg1, %c0_i32 : i32, i32
  }
  func.func @transform_1(%arg0: i32, %arg1: i32) -> (i32, i32) {
    %c0_i32 = arith.constant 0 : i32
    %c0_i32_0 = arith.constant 0 : i32
    return %c0_i32, %arg0 : i32, i32
  }
  func.func @transform_2(%arg0: i32, %arg1: i32) -> (i32, i32) {
    %c0_i32 = arith.constant 0 : i32
    %c0_i32_0 = arith.constant 0 : i32
    return %c0_i32, %arg0 : i32, i32
  }
  func.func @transform_3(%arg0: i32, %arg1: i32) -> (i32, i32) {
    %c0_i32 = arith.constant 0 : i32
    return %arg1, %arg0 : i32, i32
  }
}

module attributes {stable_mosaic.version = 11 : i64} {
  func.func @_kerne_linear_kernel_bias(%arg0: i32, %arg1: i32, %arg2: memref<8x32xbf16, #tpu.memory_space<vmem>>, %arg3: memref<32x128xbf16, #tpu.memory_space<vmem>>, %arg4: memref<1x128xbf16, #tpu.memory_space<vmem>>, %arg5: memref<8x128xf32, #tpu.memory_space<vmem>>) attributes {dimension_semantics = [#tpu.dimension_semantics<parallel>, #tpu.dimension_semantics<parallel>], iteration_bounds = array<i64: 1, 2>, scalar_prefetch = 0 : i64, scratch_operands = 0 : i64, tpu.core_type = #tpu.core_type<tc>, window_params = [{transform_indices = @transform_0, window_bounds = array<i64: 8, 32>}, {transform_indices = @transform_1, window_bounds = array<i64: 32, 128>}, {transform_indices = @transform_2, window_bounds = array<i64: 1, 128>}, {transform_indices = @transform_3, window_bounds = array<i64: 8, 128>}]} {
    %c0 = arith.constant 0 : index
    %c0_0 = arith.constant 0 : index
    %0 = vector.load %arg2[%c0, %c0_0] : memref<8x32xbf16, #tpu.memory_space<vmem>>, vector<8x32xbf16>
    %c0_1 = arith.constant 0 : index
    %c0_2 = arith.constant 0 : index
    %1 = vector.load %arg3[%c0_1, %c0_2] : memref<32x128xbf16, #tpu.memory_space<vmem>>, vector<32x128xbf16>
    %cst = arith.constant dense<0.000000e+00> : vector<8x128xf32>
    %2 = tpu.matmul %0, %1, %cst {dimension_numbers = #tpu.dot_dimension_numbers<[1], [0], [0], [1], [0, 0, 1, 1], [], []>} : vector<8x32xbf16>, vector<32x128xbf16>, vector<8x128xf32> -> vector<8x128xf32>
    %c0_3 = arith.constant 0 : index
    %c0_4 = arith.constant 0 : index
    %3 = vector.load %arg4[%c0_3, %c0_4] : memref<1x128xbf16, #tpu.memory_space<vmem>>, vector<1x128xbf16>
    %4 = arith.extf %3 : vector<1x128xbf16> to vector<1x128xf32>
    %5 = vector.broadcast %4 : vector<1x128xf32> to vector<8x128xf32>
    %6 = arith.addf %2, %5 : vector<8x128xf32>
    %c0_5 = arith.constant 0 : index
    %c0_6 = arith.constant 0 : index
    %7 = vector.load %arg5[%c0_5, %c0_6] : memref<8x128xf32, #tpu.memory_space<vmem>>, vector<8x128xf32>
    tpu.vector_store %arg5[%c0_5, %c0_6], %6 {strides = array<i32>} : memref<8x128xf32, #tpu.memory_space<vmem>>, vector<8x128xf32>,
    return
  }
  func.func @transform_0(%arg0: i32, %arg1: i32) -> (i32, i32) {
    %c0_i32 = arith.constant 0 : i32
    %c0_i32_0 = arith.constant 0 : i32
    return %arg1, %c0_i32 : i32, i32
  }
  func.func @transform_1(%arg0: i32, %arg1: i32) -> (i32, i32) {
    %c0_i32 = arith.constant 0 : i32
    %c0_i32_0 = arith.constant 0 : i32
    return %c0_i32, %arg0 : i32, i32
  }
  func.func @transform_2(%arg0: i32, %arg1: i32) -> (i32, i32) {
    %c0_i32 = arith.constant 0 : i32
    %c0_i32_0 = arith.constant 0 : i32
    return %c0_i32, %arg0 : i32, i32
  }
  func.func @transform_3(%arg0: i32, %arg1: i32) -> (i32, i32) {
    %c0_i32 = arith.constant 0 : i32
    return %arg1, %arg0 : i32, i32
  }
}

</mosaic_0001>

<bundles_post_ra>
// kernel: tpu_custom_call.1
= control target key start
LH: loop header
LB: loop body
LE: loop exit
PB: predicated region body
PF: predicated region fallthrough
CT: control target
= control target key end

     0   :  { %8 = vsyncpa [#allocation3], 0  ;;  %s819_s0 = inlined_call_operand.hbm [shape: bf16[16,32], index: 0, kind: input, shape index: {}]   ;;  %s820_s1 = inlined_call_operand.hbm [shape: bf16[32,128], index: 1, kind: input, shape index: {}]   ;;  %s821_s2 = inlined_call_operand.vmem [shape: bf16[1,128], index: 2, kind: input, shape index: {}]   ;;  %s822_s3 = inlined_call_operand.hbm [shape: f32[16,128], index: 3, kind: output, shape index: {}]  }
   0x1   :  { %10 = vsyncpa [#allocation3 + $0x1], 0 }
   0x2   :  { %11 = vsyncpa [#allocation6], 0 }
   0x3   :  { %12 = vsyncpa [#allocation4], 0 }
   0x4   :  { %14 = vsyncpa [#allocation4 + $0x1], 0  ;;  %s672_s12 = smov 0   ;;  %s674_s13 = smov 0  }
   0x5   :  { %s676_s14 = smov 0   ;;  %s678_s15 = smov 0  }
   0x6   :  { %s680_s16 = smov 0   ;;  %s682_s17 = smov 0  }
   0x7 LB: > { %s399_s18 = sadd.s32 4294967295, %s647_s17   ;;  %p401_p0 = scmp.ge.s32.totalorder %s647_s17, 1  ;;  %s647_s17 = sphi %s682_s17, %s20_s17   ;;  %s643_s16 = sphi %s680_s16, %s833_s16   ;;  %s639_s15 = sphi %s678_s15, %s832_s15   ;;  %s635_s14 = sphi %s676_s14, %s831_s14   ;;  %s631_s13 = sphi %s674_s13, %s830_s13   ;;  %s627_s12 = sphi %s672_s12, %s829_s12  }
   0x8   : > { %p704_p1 = scmp.eq.s32.totalorder %s399_s18, 0  ;;  %p143_p2 = scmp.lt.s32.totalorder %s647_s17, 3 }
   0x9   : > { %s156_s22 = sshll.u32 %s820_s1, 4  ;;  %s649_s24 = smov [#allocation5]   ;;  %s157_s22 = int_to_ptr.hbm [resolvable:$true] %s156_s22 }
   0xa   : > { %p712_p3 = pnand %p401_p0, %p143_p2  ;;  %s158_s25 = sshll.u32 %s649_s24, 4  ;;  %s159_s25 = int_to_ptr.vmem [resolvable:$true] %s158_s25 }
   0xb   : > { %p404_p6 = scmp.ge.s32.totalorder %s647_s17, 2  ;;  %s650_s26 = smov 64  }
   0xc   : > { %p434_p4 = pneg %p712_p3  ;;  %s651_s27 = smov 4  }
   0xd   : > { %s400_s28 = sadd.s32 4294967294, %s647_s17   ;;  %s29_s29 = sadd.s32 1, %s643_s16 }
   0xe   : > { %p435_p5 = pnand %p434_p4, %p704_p1  ;;  %s39_s30 = sadd.s32 1, %s635_s14 }
   0xf   : > { %p30_p7 = scmp.ge.s32.totalorder %s29_s29, 2  ;;  %p46_p8 = scmp.ne.s32.totalorder %s635_s14, %s631_s13 }
  0x10   : > { %437 = dma.hbm_to_vmem [thread:$0]  (!%p435_p5), %s157_s22, 256, %s159_s25, [#allocation6], %s650_s26, %s650_s26, %s651_s27  }
  0x11   : > { %p47_p9 = scmp.eq.s32.totalorder %s647_s17, 0  ;;  %p52_p10 = scmp.ne.s32.totalorder %s631_s13, %s627_s12 }
  0x12   : > { %s835_s29 = smov (%p30_p7, %s29_s29), 0  ;;  %p130_p13 = scmp.eq.s32.totalorder %s399_s18, 1 }
  0x13   : > { %p731_p11 = por %p47_p9, %p46_p8  ;;  %p737_p12 = por %p704_p1, %p52_p10 }
  0x14   : > { %s36_s6 = ssub.s32 %s643_s16, %s835_s29  ;;  %p136_p2 = scmp.eq.s32.totalorder %s400_s28, 1 }
  0x15   : > { %p37_p0 = scmp.eq.s32.totalorder %s36_s6, 0  ;;  %p743_p4 = por %p130_p13, %p46_p8 }
  0x16   : > { %p447_p5 = scmp.lt.s32.totalorder %s647_s17, 2  ;;  %p751_p7 = por %p136_p2, %p52_p10 }
  0x17   : > { %s749_s8 = scalar_select %p37_p0, %s635_s14, %s39_s30  }
  0x18   : > { %s178_s10 = sand.u32 1, %s635_s14   ;;  %s406_s20 = sshll.u32 %s643_s16, 2 }
  0x19   : > { %s405_s11 = sshll.u32 %s178_s10, 2  ;;  %s186_s18 = scalar_lea.hbm %s819_s0, %s406_s20 }
  0x1a   : > { %s182_s24 = scalar_lea.vmem [#allocation2], %s405_s11  ;;  %s188_s26 = sshll.u32 %s186_s18, 4  ;;  %s189_s26 = int_to_ptr.hbm [resolvable:$true] %s188_s26 }
  0x1b   : > { %s190_s25 = sshll.u32 %s182_s24, 4  ;;  %p439_p8 = pnand %p447_p5, %p731_p11  ;;  %s191_s25 = int_to_ptr.vmem [resolvable:$true] %s190_s25 }
  0x1c   : > { %s179_s27 = scalar_lea.sflag [#allocation3], %s178_s10  ;;  %199 = sbr.rel (%p712_p3) target bundleno = 178 (0xb2), region = 32 }
  0x1d   : > { %441 = dma.hbm_to_vmem [thread:$0]  (!%p439_p8), %s189_s26, 64, %s191_s25, %s179_s27  }
  0x1e   : > { %s765_s28 = sand.u32 (!%p712_p3), 1, %s631_s13  }
  0x1f   : > { %s408_s30 = sshll.u32 (!%p712_p3), %s765_s28, 2  ;;  %s202_s6 = scalar_lea.sflag (!%p712_p3), [#allocation3], %s765_s28 }
  0x20   : > { %s205_s11 = scalar_lea.vmem (!%p712_p3), [#allocation2], %s408_s30 }
  0x21   : > { %614 = dma.done.wait (%p737_p12), %s202_s6, 64  }
  0x22   : > { %616 = vsyncadd (%p737_p12), %s202_s6, 4294967232 }
  0x23   : > { %618 = dma.done.wait (%p704_p1), [#allocation6], 256  }
  0x24   : > { %620 = vsyncadd (%p704_p1), [#allocation6], 4294967040  ;;  %v425_v0 = vld [vmem:[#allocation5 + $0x8] sm:$0xff]  ;;  %v424_v1 = vld [vmem:[#allocation5] sm:$0xff]  ;;  %vm261_vm0 = vcmask 261120   ;;  %s421_s5 = sshll.u32 %s639_s15, 3 }
  0x25   : > { %271 = vmatpush.bf16.msra.mxu0 %v425_v0  ;;  %v241_v2 = vld [vmem:[%s205_s11] sm:$0xf]  ;;  %s410_s10 = sshll.u32 %s765_s28, 3  ;;  %s291_s21 = scalar_lea.hbm %s822_s3, %s421_s5 }
  0x26   : > { %v246_v3 = vld [vmem:[%s821_s2] sm:$0x1]  ;;  %s236_s22 = scalar_lea.vmem [#allocation7], %s410_s10  ;;  %s295_s24 = sshll.u32 %s291_s21, 4  ;;  %s296_s24 = int_to_ptr.hbm [resolvable:$true] %s295_s24 }
  0x27   : > { %v247_v4 = vunpack.c.l.bf16 %v246_v3  ;;  %s293_s18 = sshll.u32 %s236_s22, 4  ;;  %s280_s25 = scalar_lea.sflag [#allocation4], %s765_s28  ;;  %s294_s18 = int_to_ptr.vmem [resolvable:$true] %s293_s18 }
  0x28   : > { %s575_s26 = sshra.s32 %s296_s24, 4  ;;  %s581_s6 = scalar_lea.hbm %s822_s3, 16  ;;  %s576_s26 = int_to_ptr.hbm [resolvable:$true] %s575_s26 }
  0x29   : > { %272 = vmatpush.bf16.msra.mxu0 %v424_v1  ;;  %v248_v5 = vperm.slane %v247_v4, 0  ;;  %s577_s15 = scalar_lea.hbm %s576_s26, 8  ;;  %p582_p10 = scmp.lt.s32.totalorder %s576_s26, %s822_s3 }
  0x2a   : > { %p578_p1 = scmp.ne.s32.totalorder %s576_s26, %s577_s15  ;;  %p583_p11 = scmp.lt.s32.totalorder %s581_s6, %s577_s15 }
  0x2c   : > { %419 = vmatmul.msk.bf16.vlgmr.msra.gmra.mxu0 %vm261_vm0, %v241_v2  ;;  %p579_p3 = pnand %p578_p1, %p743_p4  ;;  %p584_p12 = por %p583_p11, %p582_p10 }
  0x2e   : > { %p580_p9 = pneg %p579_p3 }
  0x30   : > { %p585_p13 = pnand %p584_p12, %p580_p9 }
  0xa9   : > { %v274_v6 = vpop.f32.mrf.mxu0 }
  0xaa   : > { %v275_v7 = vadd.f32 %v274_v6, %v248_v5 }
  0xac   : > { %278 = vst [vmem:[%s236_s22] sm:$0xff] %v275_v7 }
  0xad   : > { %588 = shalt.err (!%p585_p13)
}
  0xae   : > { %432 = dma.vmem_to_hbm [thread:$0]  (%p743_p4), %s294_s18, 128, %s296_s24, %s280_s25  }
  0xb1   : > { %v276_v8 = vpop.f32.mrf.mxu0 }
  0xb2 PF: > { %s307_s28 = sand.u32 1, %s627_s12   ;;  %p443_p0 = pnand %p404_p6, %p751_p7 }
  0xb3   : > { %s308_s4 = scalar_lea.sflag [#allocation4], %s307_s28 }
  0xb4   : > { %p444_p2 = pneg %p443_p0 }
  0xb6   : > { %622 = dma.done.wait (%p444_p2), %s308_s4, 128  }
  0xb7   : > { %624 = vsyncadd (%p444_p2), %s308_s4, 4294967168  ;;  %s20_s17 = sadd.s32 1, %s647_s17   ;;  %s829_s12 = smov %s631_s13 }
  0xb8   : > { %p17_p5 = scmp.ge.s32.totalorder %s20_s17, 4   ;;  %s830_s13 = smov %s635_s14 }
  0xb9   : > { %s831_s14 = smov %s749_s8  ;;  %s832_s15 = smov %s643_s16 }
  0xba   : > { %s833_s16 = smov %s835_s29  ;;  %19 = sbr.rel (!%p17_p5) target bundleno = 7 (0x7), region = 85 }
  0xbf   :  { %314 = vsyncpa [#allocation3], 1 }
  0xc0   :  { %316 = vsyncpa [#allocation3 + $0x1], 1 }
  0xc1   :  { %317 = vsyncpa [#allocation6], 1 }
  0xc2   :  { %318 = vsyncpa [#allocation4], 1 }
  0xc3   :  { %320 = vsyncpa [#allocation4 + $0x1], 1 }

// kernel: tpu_custom_call.1
= control target key start
LH: loop header
LB: loop body
LE: loop exit
PB: predicated region body
PF: predicated region fallthrough
CT: control target
= control target key end

     0   :  { %8 = vsyncpa [#allocation3], 0  ;;  %s819_s0 = inlined_call_operand.hbm [shape: bf16[16,32], index: 0, kind: input, shape index: {}]   ;;  %s820_s1 = inlined_call_operand.hbm [shape: bf16[32,128], index: 1, kind: input, shape index: {}]   ;;  %s821_s2 = inlined_call_operand.vmem [shape: bf16[1,128], index: 2, kind: input, shape index: {}]   ;;  %s822_s3 = inlined_call_operand.hbm [shape: f32[16,128], index: 3, kind: output, shape index: {}]  }
   0x1   :  { %10 = vsyncpa [#allocation3 + $0x1], 0 }
   0x2   :  { %11 = vsyncpa [#allocation6], 0 }
   0x3   :  { %12 = vsyncpa [#allocation4], 0 }
   0x4   :  { %14 = vsyncpa [#allocation4 + $0x1], 0  ;;  %s672_s12 = smov 0   ;;  %s674_s13 = smov 0  }
   0x5   :  { %s676_s14 = smov 0   ;;  %s678_s15 = smov 0  }
   0x6   :  { %s680_s16 = smov 0   ;;  %s682_s17 = smov 0  }
   0x7 LB: > { %s399_s18 = sadd.s32 4294967295, %s647_s17   ;;  %p401_p0 = scmp.ge.s32.totalorder %s647_s17, 1  ;;  %s647_s17 = sphi %s682_s17, %s20_s17   ;;  %s643_s16 = sphi %s680_s16, %s833_s16   ;;  %s639_s15 = sphi %s678_s15, %s832_s15   ;;  %s635_s14 = sphi %s676_s14, %s831_s14   ;;  %s631_s13 = sphi %s674_s13, %s830_s13   ;;  %s627_s12 = sphi %s672_s12, %s829_s12  }
   0x8   : > { %p704_p1 = scmp.eq.s32.totalorder %s399_s18, 0  ;;  %p143_p2 = scmp.lt.s32.totalorder %s647_s17, 3 }
   0x9   : > { %s156_s22 = sshll.u32 %s820_s1, 4  ;;  %s649_s24 = smov [#allocation5]   ;;  %s157_s22 = int_to_ptr.hbm [resolvable:$true] %s156_s22 }
   0xa   : > { %p712_p3 = pnand %p401_p0, %p143_p2  ;;  %s158_s25 = sshll.u32 %s649_s24, 4  ;;  %s159_s25 = int_to_ptr.vmem [resolvable:$true] %s158_s25 }
   0xb   : > { %p404_p6 = scmp.ge.s32.totalorder %s647_s17, 2  ;;  %s650_s26 = smov 64  }
   0xc   : > { %p434_p4 = pneg %p712_p3  ;;  %s651_s27 = smov 4  }
   0xd   : > { %s400_s28 = sadd.s32 4294967294, %s647_s17   ;;  %s29_s29 = sadd.s32 1, %s643_s16 }
   0xe   : > { %p435_p5 = pnand %p434_p4, %p704_p1  ;;  %s39_s30 = sadd.s32 1, %s635_s14 }
   0xf   : > { %p30_p7 = scmp.ge.s32.totalorder %s29_s29, 2  ;;  %p46_p8 = scmp.ne.s32.totalorder %s635_s14, %s631_s13 }
  0x10   : > { %437 = dma.hbm_to_vmem [thread:$0]  (!%p435_p5), %s157_s22, 256, %s159_s25, [#allocation6], %s650_s26, %s650_s26, %s651_s27  }
  0x11   : > { %p47_p9 = scmp.eq.s32.totalorder %s647_s17, 0  ;;  %p52_p10 = scmp.ne.s32.totalorder %s631_s13, %s627_s12 }
  0x12   : > { %s835_s29 = smov (%p30_p7, %s29_s29), 0  ;;  %p130_p13 = scmp.eq.s32.totalorder %s399_s18, 1 }
  0x13   : > { %p731_p11 = por %p47_p9, %p46_p8  ;;  %p737_p12 = por %p704_p1, %p52_p10 }
  0x14   : > { %s36_s6 = ssub.s32 %s643_s16, %s835_s29  ;;  %p136_p2 = scmp.eq.s32.totalorder %s400_s28, 1 }
  0x15   : > { %p37_p0 = scmp.eq.s32.totalorder %s36_s6, 0  ;;  %p743_p4 = por %p130_p13, %p46_p8 }
  0x16   : > { %p447_p5 = scmp.lt.s32.totalorder %s647_s17, 2  ;;  %p751_p7 = por %p136_p2, %p52_p10 }
  0x17   : > { %s749_s8 = scalar_select %p37_p0, %s635_s14, %s39_s30  }
  0x18   : > { %s178_s10 = sand.u32 1, %s635_s14   ;;  %s406_s20 = sshll.u32 %s643_s16, 2 }
  0x19   : > { %s405_s11 = sshll.u32 %s178_s10, 2  ;;  %s186_s18 = scalar_lea.hbm %s819_s0, %s406_s20 }
  0x1a   : > { %s182_s24 = scalar_lea.vmem [#allocation2], %s405_s11  ;;  %s188_s26 = sshll.u32 %s186_s18, 4  ;;  %s189_s26 = int_to_ptr.hbm [resolvable:$true] %s188_s26 }
  0x1b   : > { %s190_s25 = sshll.u32 %s182_s24, 4  ;;  %p439_p8 = pnand %p447_p5, %p731_p11  ;;  %s191_s25 = int_to_ptr.vmem [resolvable:$true] %s190_s25 }
  0x1c   : > { %s179_s27 = scalar_lea.sflag [#allocation3], %s178_s10  ;;  %199 = sbr.rel (%p712_p3) target bundleno = 178 (0xb2), region = 32 }
  0x1d   : > { %441 = dma.hbm_to_vmem [thread:$0]  (!%p439_p8), %s189_s26, 64, %s191_s25, %s179_s27  }
  0x1e   : > { %s765_s28 = sand.u32 (!%p712_p3), 1, %s631_s13  }
  0x1f   : > { %s408_s30 = sshll.u32 (!%p712_p3), %s765_s28, 2  ;;  %s202_s6 = scalar_lea.sflag (!%p712_p3), [#allocation3], %s765_s28 }
  0x20   : > { %s205_s11 = scalar_lea.vmem (!%p712_p3), [#allocation2], %s408_s30 }
  0x21   : > { %614 = dma.done.wait (%p737_p12), %s202_s6, 64  }
  0x22   : > { %616 = vsyncadd (%p737_p12), %s202_s6, 4294967232 }
  0x23   : > { %618 = dma.done.wait (%p704_p1), [#allocation6], 256  }
  0x24   : > { %620 = vsyncadd (%p704_p1), [#allocation6], 4294967040  ;;  %v425_v0 = vld [vmem:[#allocation5 + $0x8] sm:$0xff]  ;;  %v424_v1 = vld [vmem:[#allocation5] sm:$0xff]  ;;  %vm261_vm0 = vcmask 261120   ;;  %s421_s5 = sshll.u32 %s639_s15, 3 }
  0x25   : > { %271 = vmatpush.bf16.msra.mxu0 %v425_v0  ;;  %v241_v2 = vld [vmem:[%s205_s11] sm:$0xf]  ;;  %s410_s10 = sshll.u32 %s765_s28, 3  ;;  %s291_s21 = scalar_lea.hbm %s822_s3, %s421_s5 }
  0x26   : > { %v246_v3 = vld [vmem:[%s821_s2] sm:$0x1]  ;;  %s236_s22 = scalar_lea.vmem [#allocation7], %s410_s10  ;;  %s295_s24 = sshll.u32 %s291_s21, 4  ;;  %s296_s24 = int_to_ptr.hbm [resolvable:$true] %s295_s24 }
  0x27   : > { %v247_v4 = vunpack.c.l.bf16 %v246_v3  ;;  %s293_s18 = sshll.u32 %s236_s22, 4  ;;  %s280_s25 = scalar_lea.sflag [#allocation4], %s765_s28  ;;  %s294_s18 = int_to_ptr.vmem [resolvable:$true] %s293_s18 }
  0x28   : > { %s575_s26 = sshra.s32 %s296_s24, 4  ;;  %s581_s6 = scalar_lea.hbm %s822_s3, 16  ;;  %s576_s26 = int_to_ptr.hbm [resolvable:$true] %s575_s26 }
  0x29   : > { %272 = vmatpush.bf16.msra.mxu0 %v424_v1  ;;  %v248_v5 = vperm.slane %v247_v4, 0  ;;  %s577_s15 = scalar_lea.hbm %s576_s26, 8  ;;  %p582_p10 = scmp.lt.s32.totalorder %s576_s26, %s822_s3 }
  0x2a   : > { %p578_p1 = scmp.ne.s32.totalorder %s576_s26, %s577_s15  ;;  %p583_p11 = scmp.lt.s32.totalorder %s581_s6, %s577_s15 }
  0x2c   : > { %419 = vmatmul.msk.bf16.vlgmr.msra.gmra.mxu0 %vm261_vm0, %v241_v2  ;;  %p579_p3 = pnand %p578_p1, %p743_p4  ;;  %p584_p12 = por %p583_p11, %p582_p10 }
  0x2e   : > { %p580_p9 = pneg %p579_p3 }
  0x30   : > { %p585_p13 = pnand %p584_p12, %p580_p9 }
  0xa9   : > { %v274_v6 = vpop.f32.mrf.mxu0 }
  0xaa   : > { %v275_v7 = vadd.f32 %v274_v6, %v248_v5 }
  0xac   : > { %278 = vst [vmem:[%s236_s22] sm:$0xff] %v275_v7 }
  0xad   : > { %588 = shalt.err (!%p585_p13)
}
  0xae   : > { %432 = dma.vmem_to_hbm [thread:$0]  (%p743_p4), %s294_s18, 128, %s296_s24, %s280_s25  }
  0xb1   : > { %v276_v8 = vpop.f32.mrf.mxu0 }
  0xb2 PF: > { %s307_s28 = sand.u32 1, %s627_s12   ;;  %p443_p0 = pnand %p404_p6, %p751_p7 }
  0xb3   : > { %s308_s4 = scalar_lea.sflag [#allocation4], %s307_s28 }
  0xb4   : > { %p444_p2 = pneg %p443_p0 }
  0xb6   : > { %622 = dma.done.wait (%p444_p2), %s308_s4, 128  }
  0xb7   : > { %624 = vsyncadd (%p444_p2), %s308_s4, 4294967168  ;;  %s20_s17 = sadd.s32 1, %s647_s17   ;;  %s829_s12 = smov %s631_s13 }
  0xb8   : > { %p17_p5 = scmp.ge.s32.totalorder %s20_s17, 4   ;;  %s830_s13 = smov %s635_s14 }
  0xb9   : > { %s831_s14 = smov %s749_s8  ;;  %s832_s15 = smov %s643_s16 }
  0xba   : > { %s833_s16 = smov %s835_s29  ;;  %19 = sbr.rel (!%p17_p5) target bundleno = 7 (0x7), region = 85 }
  0xbf   :  { %314 = vsyncpa [#allocation3], 1 }
  0xc0   :  { %316 = vsyncpa [#allocation3 + $0x1], 1 }
  0xc1   :  { %317 = vsyncpa [#allocation6], 1 }
  0xc2   :  { %318 = vsyncpa [#allocation4], 1 }
  0xc3   :  { %320 = vsyncpa [#allocation4 + $0x1], 1 }

</bundles_post_ra>
